<compile_context>
chip_gen: v7x
topology: tpu7x:2x2x1
jax: 0.10.0
libtpu: 0.0.40
codegen_flags: <defaults>
</compile_context>

<pallas_src>
import functools

import jax
import jax.numpy as jnp
from jax import lax
from jax.experimental import pallas as pl
from jax.experimental.pallas import tpu as pltpu

KSIZE = 3          # 3x3 conv, padding = (3 - 1) // 2 = 1, stride = 1
COUT_TILE = 128    # lane-dense output / weight tile on the channel-out axis


def _conv3x3_bias_relu_kernel(x_ref, w_ref, b_ref, o_ref, patch_ref,
                              *, tile_h, width, cin):
    """One (batch n, cout-tile c, row-tile h) grid step.

    x_ref:     (1, H+2, W+2, Cin)        whole padded image for batch n (resident)
    w_ref:     (9*Cin, COUT_TILE)        weight slab for this cout tile (resident)
    b_ref:     (1, COUT_TILE)            bias slab for this cout tile
    o_ref:     (1, tile_h*W, COUT_TILE)  lane-dense output tile
    patch_ref: (tile_h*W, 9*Cin)         VMEM im2col scratch
    """
    h = pl.program_id(2)
    row0 = pl.multiple_of(h * tile_h, tile_h)

    # im2col: gather the 9 shifted windows into the scratch so the 3x3 taps are
    # folded into the contraction axis (K = 9*Cin) of a single MXU matmul.
    for kh in range(KSIZE):
        rows = x_ref[0, pl.ds(row0 + kh, tile_h), :, :]          # (tile_h, W+2, Cin)
        for kw in range(KSIZE):
            tap = rows[:, kw:kw + width, :].reshape(tile_h * width, cin)
            k0 = (kh * KSIZE + kw) * cin
            patch_ref[:, k0:k0 + cin] = tap

    # One fat matmul: (tile_h*W, 9*Cin) x (9*Cin, 128) -> f32 accumulate.
    acc = jnp.dot(patch_ref[...], w_ref[...],
                  preferred_element_type=jnp.float32)
    acc = jnp.maximum(acc + b_ref[...], 0.0)                      # bias + ReLU

    # Full-width (128-lane) store, no reshape needed.
    o_ref[0, :, :] = acc.astype(o_ref.dtype)


def conv_forward(x_nchw, weight, bias, *, tile_h=8):
    """Forward pass of the `Conv` module (conv3x3 + bias + ReLU).

    x_nchw: (N, Cin, H, W) float32
    weight: (Cout, Cin, 3, 3) float32   (PyTorch nn.Conv2d layout)
    bias:   (Cout,) float32
    returns (N, Cout, H, W) float32
    """
    N, Cin, H, W = x_nchw.shape
    Cout = weight.shape[0]

    th = tile_h if (H % tile_h == 0) else H       # row-tile height
    cout_p = ((Cout + COUT_TILE - 1) // COUT_TILE) * COUT_TILE
    n_ct = cout_p // COUT_TILE
    n_ht = H // th

    # NCHW -> NHWC with a 1-pixel halo (XLA fuses transpose+pad into one copy).
    x_nhwc = jnp.transpose(x_nchw, (0, 2, 3, 1))
    x_pad = jnp.pad(x_nhwc, ((0, 0), (1, 1), (1, 1), (0, 0)))

    # (Cout, Cin, kh, kw) -> (kh, kw, Cin, Cout) -> (9*Cin, Cout), zero-pad the
    # output-channel axis up to the 128-lane tile.
    w_mat = jnp.transpose(weight, (2, 3, 1, 0)).reshape(KSIZE * KSIZE * Cin, Cout)
    w_mat = jnp.pad(w_mat, ((0, 0), (0, cout_p - Cout)))
    b_mat = jnp.pad(bias.reshape(1, Cout), ((0, 0), (0, cout_p - Cout)))

    kernel = functools.partial(_conv3x3_bias_relu_kernel,
                               tile_h=th, width=W, cin=Cin)

    out_flat = pl.pallas_call(
        kernel,
        out_shape=jax.ShapeDtypeStruct((N, H * W, cout_p), x_nchw.dtype),
        grid_spec=pltpu.PrefetchScalarGridSpec(
            num_scalar_prefetch=0,
            grid=(N, n_ct, n_ht),
            in_specs=[
                # Whole padded image for batch n; block index ignores (c, h) so
                # it stays VMEM-resident across those axes (no re-DMA).
                pl.BlockSpec((1, H + 2, W + 2, Cin), lambda n, c, h: (n, 0, 0, 0)),
                pl.BlockSpec((KSIZE * KSIZE * Cin, COUT_TILE), lambda n, c, h: (0, c)),
                pl.BlockSpec((1, COUT_TILE), lambda n, c, h: (0, c)),
            ],
            out_specs=pl.BlockSpec((1, th * W, COUT_TILE), lambda n, c, h: (n, h, c)),
            scratch_shapes=[pltpu.VMEM((th * W, KSIZE * KSIZE * Cin), jnp.float32)],
        ),
        compiler_params=pltpu.CompilerParams(
            dimension_semantics=("parallel", "parallel", "parallel"),
            vmem_limit_bytes=32 * 1024 * 1024,
        ),
    )(x_pad, w_mat, b_mat)

    # (N, H*W, Cout_pad) is byte-identical to (N, H, W, Cout_pad): free reshape,
    # drop the lane padding, then back to the module's NCHW convention.
    out_nhwc = out_flat.reshape(N, H, W, cout_p)[:, :, :, :Cout]
    return jnp.transpose(out_nhwc, (0, 3, 1, 2))


def _reference_conv(x_nchw, weight, bias):
    """Pure-JAX reference (lax conv) for correctness check."""
    out = lax.conv_general_dilated(
        x_nchw, weight,
        window_strides=(1, 1),
        padding=((1, 1), (1, 1)),
        dimension_numbers=("NCHW", "OIHW", "NCHW"))
    out = out + bias[None, :, None, None]
    return jnp.maximum(out, 0.0)


if __name__ == "__main__":
    key = jax.random.PRNGKey(0)
    k_x, k_w, k_b = jax.random.split(key, 3)

    # Small shapes consistent with the module: batch=2, inp_dim=4, out_dim=8, 16x16.
    N, Cin, Cout, H, W = 2, 4, 8, 16, 16

    x = jax.random.normal(k_x, (N, Cin, H, W), dtype=jnp.float32)
    fan_in = Cin * KSIZE * KSIZE
    bound = 1.0 / (fan_in ** 0.5)
    weight = jax.random.uniform(k_w, (Cout, Cin, KSIZE, KSIZE),
                                dtype=jnp.float32, minval=-bound, maxval=bound)
    bias = jax.random.uniform(k_b, (Cout,), dtype=jnp.float32,
                              minval=-bound, maxval=bound)

    out = jax.jit(conv_forward)(x, weight, bias)
    jax.block_until_ready(out)

    ref = _reference_conv(x, weight, bias)
    assert out.shape == (N, Cout, H, W)
    assert jnp.allclose(out, ref, atol=1e-4, rtol=1e-4), "mismatch vs reference"

    print("KERNEL_OK")
</pallas_src>

<mosaic_0001>
module attributes {stable_mosaic.version = 11 : i64} {
  func.func @_conv3x3_bias_relu_kernel(%arg0: i32, %arg1: i32, %arg2: i32, %arg3: memref<1x18x18x4xf32, #tpu.memory_space<vmem>>, %arg4: memref<36x128xf32, #tpu.memory_space<vmem>>, %arg5: memref<1x128xf32, #tpu.memory_space<vmem>>, %arg6: memref<1x128x128xf32, #tpu.memory_space<vmem>>, %arg7: memref<128x36xf32, #tpu.memory_space<vmem>>) attributes {dimension_semantics = [#tpu.dimension_semantics<parallel>, #tpu.dimension_semantics<parallel>, #tpu.dimension_semantics<parallel>], iteration_bounds = array<i64: 2, 1, 2>, scalar_prefetch = 0 : i64, scratch_operands = 1 : i64, tpu.core_type = #tpu.core_type<tc>, window_params = [{transform_indices = @transform_0, window_bounds = array<i64: 1, 18, 18, 4>}, {transform_indices = @transform_1, window_bounds = array<i64: 36, 128>}, {transform_indices = @transform_2, window_bounds = array<i64: 1, 128>}, {transform_indices = @transform_3, window_bounds = array<i64: 1, 128, 128>}]} {
    %c8_i32 = arith.constant 8 : i32
    %0 = arith.muli %arg2, %c8_i32 : i32
    %1 = tpu.assume_multiple %0, 8 : i32
    %c0_i32 = arith.constant 0 : i32
    %2 = arith.addi %1, %c0_i32 : i32
    %c0 = arith.constant 0 : index
    %3 = arith.index_cast %2 : i32 to index
    %c0_0 = arith.constant 0 : index
    %c0_1 = arith.constant 0 : index
    %4 = vector.load %arg3[%c0, %3, %c0_0, %c0_1] : memref<1x18x18x4xf32, #tpu.memory_space<vmem>>, vector<1x8x18x4xf32>
    %5 = vector.shape_cast %4 : vector<1x8x18x4xf32> to vector<8x18x4xf32>
    %6 = vector.extract_strided_slice %5 {offsets = [0, 0, 0], sizes = [8, 16, 4], strides = [1, 1, 1]} : vector<8x18x4xf32> to vector<8x16x4xf32>
    %7 = vector.shape_cast %6 : vector<8x16x4xf32> to vector<128x4xf32>
    %c0_2 = arith.constant 0 : index
    %c0_3 = arith.constant 0 : index
    %8 = vector.load %arg7[%c0_2, %c0_3] : memref<128x36xf32, #tpu.memory_space<vmem>>, vector<128x4xf32>
    tpu.vector_store %arg7[%c0_2, %c0_3], %7 {strides = array<i32>} : memref<128x36xf32, #tpu.memory_space<vmem>>, vector<128x4xf32>,
    %9 = vector.extract_strided_slice %5 {offsets = [0, 1, 0], sizes = [8, 16, 4], strides = [1, 1, 1]} : vector<8x18x4xf32> to vector<8x16x4xf32>
    %10 = vector.shape_cast %9 : vector<8x16x4xf32> to vector<128x4xf32>
    %c0_4 = arith.constant 0 : index
    %c4 = arith.constant 4 : index
    %11 = vector.load %arg7[%c0_4, %c4] : memref<128x36xf32, #tpu.memory_space<vmem>>, vector<128x4xf32>
    tpu.vector_store %arg7[%c0_4, %c4], %10 {strides = array<i32>} : memref<128x36xf32, #tpu.memory_space<vmem>>, vector<128x4xf32>,
    %12 = vector.extract_strided_slice %5 {offsets = [0, 2, 0], sizes = [8, 16, 4], strides = [1, 1, 1]} : vector<8x18x4xf32> to vector<8x16x4xf32>
    %13 = vector.shape_cast %12 : vector<8x16x4xf32> to vector<128x4xf32>
    %c0_5 = arith.constant 0 : index
    %c8 = arith.constant 8 : index
    %14 = vector.load %arg7[%c0_5, %c8] : memref<128x36xf32, #tpu.memory_space<vmem>>, vector<128x4xf32>
    tpu.vector_store %arg7[%c0_5, %c8], %13 {strides = array<i32>} : memref<128x36xf32, #tpu.memory_space<vmem>>, vector<128x4xf32>,
    %c1_i32 = arith.constant 1 : i32
    %15 = arith.addi %1, %c1_i32 : i32
    %c0_6 = arith.constant 0 : index
    %16 = arith.index_cast %15 : i32 to index
    %c0_7 = arith.constant 0 : index
    %c0_8 = arith.constant 0 : index
    %17 = vector.load %arg3[%c0_6, %16, %c0_7, %c0_8] : memref<1x18x18x4xf32, #tpu.memory_space<vmem>>, vector<1x8x18x4xf32>
    %18 = vector.shape_cast %17 : vector<1x8x18x4xf32> to vector<8x18x4xf32>
    %19 = vector.extract_strided_slice %18 {offsets = [0, 0, 0], sizes = [8, 16, 4], strides = [1, 1, 1]} : vector<8x18x4xf32> to vector<8x16x4xf32>
    %20 = vector.shape_cast %19 : vector<8x16x4xf32> to vector<128x4xf32>
    %c0_9 = arith.constant 0 : index
    %c12 = arith.constant 12 : index
    %21 = vector.load %arg7[%c0_9, %c12] : memref<128x36xf32, #tpu.memory_space<vmem>>, vector<128x4xf32>
    tpu.vector_store %arg7[%c0_9, %c12], %20 {strides = array<i32>} : memref<128x36xf32, #tpu.memory_space<vmem>>, vector<128x4xf32>,
    %22 = vector.extract_strided_slice %18 {offsets = [0, 1, 0], sizes = [8, 16, 4], strides = [1, 1, 1]} : vector<8x18x4xf32> to vector<8x16x4xf32>
    %23 = vector.shape_cast %22 : vector<8x16x4xf32> to vector<128x4xf32>
    %c0_10 = arith.constant 0 : index
    %c16 = arith.constant 16 : index
    %24 = vector.load %arg7[%c0_10, %c16] : memref<128x36xf32, #tpu.memory_space<vmem>>, vector<128x4xf32>
    tpu.vector_store %arg7[%c0_10, %c16], %23 {strides = array<i32>} : memref<128x36xf32, #tpu.memory_space<vmem>>, vector<128x4xf32>,
    %25 = vector.extract_strided_slice %18 {offsets = [0, 2, 0], sizes = [8, 16, 4], strides = [1, 1, 1]} : vector<8x18x4xf32> to vector<8x16x4xf32>
    %26 = vector.shape_cast %25 : vector<8x16x4xf32> to vector<128x4xf32>
    %c0_11 = arith.constant 0 : index
    %c20 = arith.constant 20 : index
    %27 = vector.load %arg7[%c0_11, %c20] : memref<128x36xf32, #tpu.memory_space<vmem>>, vector<128x4xf32>
    tpu.vector_store %arg7[%c0_11, %c20], %26 {strides = array<i32>} : memref<128x36xf32, #tpu.memory_space<vmem>>, vector<128x4xf32>,
    %c2_i32 = arith.constant 2 : i32
    %28 = arith.addi %1, %c2_i32 : i32
    %c0_12 = arith.constant 0 : index
    %29 = arith.index_cast %28 : i32 to index
    %c0_13 = arith.constant 0 : index
    %c0_14 = arith.constant 0 : index
    %30 = vector.load %arg3[%c0_12, %29, %c0_13, %c0_14] : memref<1x18x18x4xf32, #tpu.memory_space<vmem>>, vector<1x8x18x4xf32>
    %31 = vector.shape_cast %30 : vector<1x8x18x4xf32> to vector<8x18x4xf32>
    %32 = vector.extract_strided_slice %31 {offsets = [0, 0, 0], sizes = [8, 16, 4], strides = [1, 1, 1]} : vector<8x18x4xf32> to vector<8x16x4xf32>
    %33 = vector.shape_cast %32 : vector<8x16x4xf32> to vector<128x4xf32>
    %c0_15 = arith.constant 0 : index
    %c24 = arith.constant 24 : index
    %34 = vector.load %arg7[%c0_15, %c24] : memref<128x36xf32, #tpu.memory_space<vmem>>, vector<128x4xf32>
    tpu.vector_store %arg7[%c0_15, %c24], %33 {strides = array<i32>} : memref<128x36xf32, #tpu.memory_space<vmem>>, vector<128x4xf32>,
    %35 = vector.extract_strided_slice %31 {offsets = [0, 1, 0], sizes = [8, 16, 4], strides = [1, 1, 1]} : vector<8x18x4xf32> to vector<8x16x4xf32>
    %36 = vector.shape_cast %35 : vector<8x16x4xf32> to vector<128x4xf32>
    %c0_16 = arith.constant 0 : index
    %c28 = arith.constant 28 : index
    %37 = vector.load %arg7[%c0_16, %c28] : memref<128x36xf32, #tpu.memory_space<vmem>>, vector<128x4xf32>
    tpu.vector_store %arg7[%c0_16, %c28], %36 {strides = array<i32>} : memref<128x36xf32, #tpu.memory_space<vmem>>, vector<128x4xf32>,
    %38 = vector.extract_strided_slice %31 {offsets = [0, 2, 0], sizes = [8, 16, 4], strides = [1, 1, 1]} : vector<8x18x4xf32> to vector<8x16x4xf32>
    %39 = vector.shape_cast %38 : vector<8x16x4xf32> to vector<128x4xf32>
    %c0_17 = arith.constant 0 : index
    %c32 = arith.constant 32 : index
    %40 = vector.load %arg7[%c0_17, %c32] : memref<128x36xf32, #tpu.memory_space<vmem>>, vector<128x4xf32>
    tpu.vector_store %arg7[%c0_17, %c32], %39 {strides = array<i32>} : memref<128x36xf32, #tpu.memory_space<vmem>>, vector<128x4xf32>,
    %c0_18 = arith.constant 0 : index
    %c0_19 = arith.constant 0 : index
    %41 = vector.load %arg7[%c0_18, %c0_19] : memref<128x36xf32, #tpu.memory_space<vmem>>, vector<128x36xf32>
    %c0_20 = arith.constant 0 : index
    %c0_21 = arith.constant 0 : index
    %42 = vector.load %arg4[%c0_20, %c0_21] : memref<36x128xf32, #tpu.memory_space<vmem>>, vector<36x128xf32>
    %cst = arith.constant dense<0.000000e+00> : vector<128x128xf32>
    %43 = tpu.matmul %41, %42, %cst {dimension_numbers = #tpu.dot_dimension_numbers<[1], [0], [0], [1], [0, 0, 1, 1], [], []>} : vector<128x36xf32>, vector<36x128xf32>, vector<128x128xf32> -> vector<128x128xf32>
    %c0_22 = arith.constant 0 : index
    %c0_23 = arith.constant 0 : index
    %44 = vector.load %arg5[%c0_22, %c0_23] : memref<1x128xf32, #tpu.memory_space<vmem>>, vector<1x128xf32>
    %45 = vector.broadcast %44 : vector<1x128xf32> to vector<128x128xf32>
    %46 = arith.addf %43, %45 : vector<128x128xf32>
    %cst_24 = arith.constant 0.000000e+00 : f32
    %47 = vector.broadcast %cst_24 : f32 to vector<128x128xf32>
    %48 = arith.maximumf %46, %47 : vector<128x128xf32>
    %c0_25 = arith.constant 0 : index
    %c0_26 = arith.constant 0 : index
    %c0_27 = arith.constant 0 : index
    %49 = vector.load %arg6[%c0_25, %c0_26, %c0_27] : memref<1x128x128xf32, #tpu.memory_space<vmem>>, vector<1x128x128xf32>
    %50 = vector.shape_cast %49 : vector<1x128x128xf32> to vector<128x128xf32>
    %51 = vector.shape_cast %48 : vector<128x128xf32> to vector<1x128x128xf32>
    tpu.vector_store %arg6[%c0_25, %c0_26, %c0_27], %51 {strides = array<i32>} : memref<1x128x128xf32, #tpu.memory_space<vmem>>, vector<1x128x128xf32>,
    return
  }
  func.func @transform_0(%arg0: i32, %arg1: i32, %arg2: i32) -> (i32, i32, i32, i32) {
    %c0_i32 = arith.constant 0 : i32
    %c0_i32_0 = arith.constant 0 : i32
    %c0_i32_1 = arith.constant 0 : i32
    %c0_i32_2 = arith.constant 0 : i32
    return %arg0, %c0_i32, %c0_i32_0, %c0_i32_1 : i32, i32, i32, i32
  }
  func.func @transform_1(%arg0: i32, %arg1: i32, %arg2: i32) -> (i32, i32) {
    %c0_i32 = arith.constant 0 : i32
    %c0_i32_0 = arith.constant 0 : i32
    return %c0_i32, %arg1 : i32, i32
  }
  func.func @transform_2(%arg0: i32, %arg1: i32, %arg2: i32) -> (i32, i32) {
    %c0_i32 = arith.constant 0 : i32
    %c0_i32_0 = arith.constant 0 : i32
    return %c0_i32, %arg1 : i32, i32
  }
  func.func @transform_3(%arg0: i32, %arg1: i32, %arg2: i32) -> (i32, i32, i32) {
    %c0_i32 = arith.constant 0 : i32
    return %arg0, %arg2, %arg1 : i32, i32, i32
  }
}

</mosaic_0001>

<bundles_post_ra>
// kernel: conv_forward.1
= control target key start
LH: loop header
LB: loop body
LE: loop exit
PB: predicated region body
PF: predicated region fallthrough
CT: control target
= control target key end

     0   :  { %s1835_s12 = smov 0   ;;  %s1837_s13 = smov 0   ;;  %s2523_s0 = inlined_call_operand.vmem [shape: f32[2,18,18,4], index: 0, kind: input, shape index: {}]   ;;  %s2524_s1 = inlined_call_operand.vmem [shape: f32[36,128], index: 1, kind: input, shape index: {}]   ;;  %s2525_s2 = inlined_call_operand.vmem [shape: f32[1,128], index: 2, kind: input, shape index: {}]   ;;  %s2526_s3 = inlined_call_operand.vmem [shape: f32[2,256,128], index: 3, kind: output, shape index: {}]  }
   0x1   :  { %s1839_s14 = smov 0   ;;  %s1841_s15 = smov 0  }
   0x2   :  { %s1843_s16 = smov 0  }
   0x3 LB: > { %s25_s17 = sadd.s32 1, %s1797_s14  ;;  %s32_s18 = sadd.s32 1, %s1801_s15  ;;  %s1805_s16 = sphi %s1843_s16, %s13_s16   ;;  %s1801_s15 = sphi %s1841_s15, %s2530_s15   ;;  %s1797_s14 = sphi %s1839_s14, %s2529_s14   ;;  %s1793_s13 = sphi %s1837_s13, %s2528_s13   ;;  %s1789_s12 = sphi %s1835_s12, %s2527_s12  }
   0x4   : > { %p26_p0 = scmp.ge.s32.totalorder %s25_s17, 2  ;;  %p1570_p1 = scmp.ge.s32.totalorder %s1805_s16, 1 }
   0x5   : > { %p177_p2 = scmp.lt.s32.totalorder %s1805_s16, 5 }
   0x6   : > { %s2532_s17 = smov (%p26_p0, %s25_s17), 0  ;;  %s2534_s18 = smov (!%p26_p0, %s32_s18), %s1801_s15 }
   0x7   : > { %p178_p3 = pnand %p1570_p1, %p177_p2  ;;  %p34_p4 = scmp.ge.s32.totalorder %s2534_s18, 2 }
   0x8   : > { %p215_p5 = scmp.lt.s32.totalorder (!%p178_p3), %s1793_s13, 1  ;;  %s1576_s19 = smul.u32 (!%p178_p3), 192, %s1789_s12  ;;  %vm267_vm0 = vcmask (!%p178_p3), 31744   ;;  %vm308_vm1 = vcmask (!%p178_p3), 1046528   ;;  %vm414_vm2 = vcmask (!%p178_p3), 1045504   ;;  %vm1249_vm3 = vcmask (!%p178_p3), 1043456  }
   0x9   : > { %s2536_s18 = smov (%p34_p4, %s2534_s18), 0  ;;  %181 = sbr.rel (%p178_p3) target bundleno = 619 (0x26b), region = 32 }
   0xa   : > { %s1807_s25 = smov (!%p178_p3), 4   ;;  %s1808_s26 = smov (!%p178_p3), 8   ;;  %vm397_vm4 = vcmask (!%p178_p3), 64544   ;;  %vm503_vm5 = vcmask (!%p178_p3), 97344   ;;  %vm611_vm6 = vcmask (!%p178_p3), 130144   ;;  %vm724_vm7 = vcmask (!%p178_p3), 162944  }
   0xb   : > { %s1809_s27 = smov (!%p178_p3), 12   ;;  %s1810_s28 = smov (!%p178_p3), 16   ;;  %vm829_vm8 = vcmask (!%p178_p3), 195744   ;;  %vm937_vm9 = vcmask (!%p178_p3), 228544   ;;  %vm1050_vm10 = vcmask (!%p178_p3), 261344   ;;  %vm1155_vm11 = vcmask (!%p178_p3), 294144  }
   0xc   : > { %s1811_s29 = smov (!%p178_p3), 20   ;;  %s1812_s30 = smov (!%p178_p3), 24   ;;  %vm1200_vm12 = vcmask (!%p178_p3), 293888  }
   0xd   : > { %s1813_s4 = smov (!%p178_p3), 28   ;;  %s1814_s9 = smov (!%p178_p3), 32  }
  0x10   : > { %s2538_s13 = smov (!%p215_p5, %s1793_s13), 1 }
  0x11   : > { %s1718_s20 = smul.u32 432, %s2538_s13 }
  0x13   : > { %s219_s23 = scalar_lea.vmem %s2523_s0, %s1718_s20 }
  0x14   : > { %s1874_s24 = scalar_lea.vmem %s219_s23, %s1576_s19  ;;  %s1572_s23 = sshll.u32 %s1789_s12, 4 }
  0x15   : > { %v1877_v0 = vld [vmem:[%s1874_s24 + $0x8] sm:$0xff]  ;;  %v1880_v1 = vld [vmem:[%s1874_s24 + $0x10] sm:$0x3]  ;;  %v243_v2 = vld [vmem:[%s1874_s24] sm:$0xff]  ;;  %p230_p6 = scmp.lt.s32.totalorder %s1572_s23, 31 }
  0x16   : > { %v310_v3 = vrot.slane %v1877_v0, 1  ;;  %v312_v4 = vrot.slane %v1880_v1, 1  ;;  %v309_v5 = vrot.slane %v243_v2, 1  ;;  %v1886_v6 = vld [vmem:[%s1874_s24 + $0x68] sm:$0xff]  ;;  %v257_v7 = vld [vmem:[%s1874_s24 + $0x70] sm:$0x3] }
  0x17   : > { %269 = vst.msk [vmem:[#allocation2 + $0x8] sm:$0xff] %vm267_vm0, %v1877_v0  ;;  %268 = vst.msk [vmem:[#allocation2] sm:$0xff] %vm267_vm0, %v243_v2  ;;  %v1893_v8 = vrot.slane %v1886_v6, 1  ;;  %v332_v9 = vrot.slane %v257_v7, 1  ;;  %v1896_v10 = vld [vmem:[%s1874_s24 + $0x60] sm:$0xff]  ;;  %v1899_v11 = vld [vmem:[%s1874_s24 + $0x78] sm:$0xff] }
  0x18   : > { %277 = vst.msk [vmem:[#allocation2 + $0x48] sm:$0xff] %vm267_vm0, %v1886_v6  ;;  %v313_v12 = vsel %vm308_vm1, %v310_v3, %v312_v4  ;;  %v311_v13 = vsel %vm308_vm1, %v309_v5, %v310_v3  ;;  %v329_v14 = vrot.slane %v1896_v10, 1  ;;  %v1907_v15 = vld [vmem:[%s1874_s24 + $0x18] sm:$0xff]  ;;  %v1910_v16 = vld [vmem:[%s1874_s24 + $0x80] sm:$0xff]  ;;  %276 = vst.msk [vmem:[#allocation2 + $0x40] sm:$0xff] %vm267_vm0, %v1896_v10  ;;  %v1922_v18 = vrot.slane %v1886_v6, 2 }
  0x19   : > { %v1913_v17 = vld [vmem:[%s1874_s24 + $0x20] sm:$0xff]  ;;  %278 = vst.msk [vmem:[#allocation2 + $0x50] sm:$0xff] %vm267_vm0, %v1899_v11  ;;  %351 = vrot.lane.b32.xlu1 %v313_v12, %s1807_s25  ;;  %349 = vrot.lane.b32.xlu0 %v311_v13, %s1807_s25  ;;  %v415_v19 = vrot.slane %v243_v2, 2  ;;  %v1925_v20 = vld [vmem:[%s1874_s24 + $0x90] sm:$0xff]  ;;  %270 = vst.msk [vmem:[#allocation2 + $0x10] sm:$0xff] %vm267_vm0, %v1907_v15  ;;  %v333_v21 = vsel %vm308_vm1, %v1893_v8, %v332_v9  ;;  %v435_v23 = vrot.slane %v1896_v10, 2 }
  0x1a   : > { %271 = vst.msk [vmem:[#allocation2 + $0x18] sm:$0xff] %vm267_vm0, %v1913_v17  ;;  %279 = vst.msk [vmem:[#allocation2 + $0x58] sm:$0xff] %vm267_vm0, %v1910_v16  ;;  %v1937_v22 = vsel %vm308_vm1, %v329_v14, %v1893_v8  ;;  %v416_v24 = vrot.slane %v1877_v0, 2  ;;  %v1944_v25 = vld [vmem:[%s1874_s24 + $0x30] sm:$0xff]  ;;  %v1947_v26 = vld [vmem:[%s1874_s24 + $0x98] sm:$0xff]  ;;  %v438_v31 = vrot.slane %v257_v7, 2 }
  0x1b   : > { %280 = vst.msk [vmem:[#allocation2 + $0x60] sm:$0xff] %vm267_vm0, %v1925_v20  ;;  %v1950_v27 = vld [vmem:[%s1874_s24 + $0x38] sm:$0xff]  ;;  %272 = vst.msk [vmem:[#allocation2 + $0x20] sm:$0xff] %vm267_vm0, %v1944_v25  ;;  %v1957_v28 = vld [vmem:[%s1874_s24 + $0xa8] sm:$0xff]  ;;  %v1968_v29 = vsel %vm414_vm2, %v435_v23, %v1922_v18  ;;  %v418_v32 = vrot.slane %v1880_v1, 2  ;;  %v656_v38 = vrot.slane %v1899_v11, 1 }
  0x1c   : > { %281 = vst.msk [vmem:[#allocation2 + $0x68] sm:$0xff] %vm267_vm0, %v1947_v26  ;;  %273 = vst.msk [vmem:[#allocation2 + $0x28] sm:$0xff] %vm267_vm0, %v1950_v27  ;;  %v417_v30 = vsel %vm414_vm2, %v415_v19, %v416_v24  ;;  %v1973_v33 = vld [vmem:[%s1874_s24 + $0x48] sm:$0xff]  ;;  %v1978_v34 = vld [vmem:[%s1874_s24 + $0xb0] sm:$0xff]  ;;  %v439_v36 = vsel %vm414_vm2, %v1922_v18, %v438_v31  ;;  %v636_v39 = vrot.slane %v1907_v15, 1  ;;  %v657_v40 = vrot.slane %v1910_v16, 1 }
  0x1d   : > { %367 = vrot.lane.b32.xlu1 %v333_v21, %s1807_s25  ;;  %365 = vrot.lane.b32.xlu0 %v1937_v22, %s1807_s25  ;;  %282 = vst.msk [vmem:[#allocation2 + $0x70] sm:$0xff] %vm267_vm0, %v1957_v28  ;;  %274 = vst.msk [vmem:[#allocation2 + $0x30] sm:$0xff] %vm267_vm0, %v1973_v33  ;;  %v1981_v35 = vld [vmem:[%s1874_s24 + $0x50] sm:$0xff]  ;;  %v419_v37 = vsel %vm414_vm2, %v416_v24, %v418_v32  ;;  %v637_v41 = vrot.slane %v1913_v17, 1  ;;  %v1593_v44 = vld [vmem:[%s1874_s24 + $0x88] sm:$0x3] }
  0x1e   : > { %283 = vst.msk [vmem:[#allocation2 + $0x78] sm:$0xff] %vm267_vm0, %v1978_v34  ;;  %275 = vst.msk [vmem:[#allocation2 + $0x38] sm:$0xff] %vm267_vm0, %v1981_v35  ;;  %v658_v42 = vsel %vm308_vm1, %v656_v38, %v657_v40  ;;  %v1581_v45 = vld [vmem:[%s1874_s24 + $0x28] sm:$0x3]  ;;  %v659_v46 = vrot.slane %v1593_v44, 1  ;;  %v761_v48 = vrot.slane %v1899_v11, 2 }
  0x1f   : > { %v638_v43 = vsel %vm308_vm1, %v636_v39, %v637_v41  ;;  %v639_v47 = vrot.slane %v1581_v45, 1  ;;  %v741_v49 = vrot.slane %v1907_v15, 2  ;;  %v762_v50 = vrot.slane %v1910_v16, 2  ;;  %v260_v54 = vld [vmem:[%s1874_s24 + $0x88] sm:$0x3]  ;;  %s2540_s23 = smov (!%p230_p6, %s1572_s23), 31 }
  0x20   : > { %v742_v51 = vrot.slane %v1913_v17, 2  ;;  %v660_v52 = vsel %vm308_vm1, %v657_v40, %v659_v46  ;;  %v248_v55 = vld [vmem:[%s1874_s24 + $0x28] sm:$0x3]  ;;  %v337_v58 = vrot.slane %v260_v54, 1  ;;  %v764_v62 = vrot.slane %v1593_v44, 2 }
  0x21   : > { %471 = vrot.lane.b32.xlu1 %v1968_v29, %s1808_s26  ;;  %455 = vrot.lane.b32.xlu0 %v417_v30, %s1808_s26  ;;  %v640_v53 = vsel %vm308_vm1, %v637_v41, %v639_v47  ;;  %v763_v56 = vsel %vm414_vm2, %v761_v48, %v762_v50  ;;  %v317_v59 = vrot.slane %v248_v55, 1  ;;  %v744_v63 = vrot.slane %v1581_v45, 2  ;;  %v1192_v46 = vld [vmem:[%s2524_s1 + $0x20] sm:$0xf] }
  0x22   : > { %v743_v57 = vsel %vm414_vm2, %v741_v49, %v742_v51  ;;  %v338_v60 = vsel %vm308_vm1, %v657_v40, %v337_v58  ;;  %v765_v0 = vsel %vm414_vm2, %v762_v50, %v764_v62  ;;  %v443_v2 = vrot.slane %v260_v54, 2  ;;  %v263_v49 = vld [vmem:[%s1874_s24 + $0xa0] sm:$0x3] }
  0x23   : > { %v318_v61 = vsel %vm308_vm1, %v637_v41, %v317_v59  ;;  %v745_v1 = vsel %vm414_vm2, %v742_v51, %v744_v63  ;;  %v423_v3 = vrot.slane %v248_v55, 2  ;;  %v982_v7 = vrot.slane %v1925_v20, 1  ;;  %v1190_v41 = vld [vmem:[%s2524_s1 + $0x10] sm:$0xff] }
  0x24   : > { %v444_v4 = vsel %vm414_vm2, %v762_v50, %v443_v2  ;;  %v962_v9 = vrot.slane %v1944_v25, 1  ;;  %v2057_v12 = vrot.slane %v1950_v27, 1  ;;  %v1087_v21 = vrot.slane %v1925_v20, 2  ;;  %v251_v50 = vld [vmem:[%s1874_s24 + $0x40] sm:$0x3] }
  0x25   : > { %473 = vrot.lane.b32.xlu1 %v439_v36, %s1808_s26  ;;  %457 = vrot.lane.b32.xlu0 %v419_v37, %s1808_s26  ;;  %v424_v5 = vsel %vm414_vm2, %v742_v51, %v423_v3  ;;  %v1067_v23 = vrot.slane %v1944_v25, 2  ;;  %v2080_v24 = vrot.slane %v1947_v26, 2  ;;  %v2083_v30 = vrot.slane %v1950_v27, 2  ;;  %v1584_v36 = vld [vmem:[%s1874_s24 + $0x40] sm:$0x3]  ;;  %v1189_v37 = vld [vmem:[%s2524_s1 + $0x8] sm:$0xff] }
  0x26   : > { %v964_v14 = vsel %vm308_vm1, %v962_v9, %v2057_v12  ;;  %v644_v40 = vrot.slane %v1584_v36, 1  ;;  %v322_v54 = vrot.slane %v251_v50, 1  ;;  %v749_v58 = vrot.slane %v1584_v36, 2 }
  0x27   : > { %v428_v62 = vrot.slane %v251_v50, 2  ;;  %v987_v9 = vrot.slane %v1957_v28, 1  ;;  %v1092_v36 = vrot.slane %v1957_v28, 2 }
  0x28   : > { %v645_v45 = vsel %vm308_vm1, %v2057_v12, %v644_v40 }
  0x29   : > { %579 = vrot.lane.b32.xlu1 %v1899_v11, %s1809_s27  ;;  %563 = vrot.lane.b32.xlu0 %v1907_v15, %s1809_s27  ;;  %v2054_v11 = vrot.slane %v1947_v26, 1  ;;  %v1619_v15 = vld [vmem:[%s1874_s24 + $0xa0] sm:$0x3]  ;;  %v429_v2 = vsel %vm414_vm2, %v2083_v30, %v428_v62 }
  0x2a   : > { %v1090_v47 = vrot.slane %v1619_v15, 2 }
  0x2b   : > { %v984_v13 = vsel %vm308_vm1, %v982_v7, %v2054_v11 }
  0x2c   : > { %v1091_v51 = vsel %vm414_vm2, %v2080_v24, %v1090_v47 }
  0x2d   : > { %581 = vrot.lane.b32.xlu1 %v1910_v16, %s1809_s27  ;;  %565 = vrot.lane.b32.xlu0 %v1913_v17, %s1809_s27  ;;  %v1607_v16 = vld [vmem:[%s1874_s24 + $0x40] sm:$0x3]  ;;  %v985_v17 = vrot.slane %v1619_v15, 1 }
  0x2e   : > { %v965_v19 = vrot.slane %v1607_v16, 1  ;;  %v1070_v48 = vrot.slane %v1607_v16, 2 }
  0x2f   : > { %v986_v31 = vsel %vm308_vm1, %v2054_v11, %v985_v17 }
  0x30   : > { %v966_v32 = vsel %vm308_vm1, %v2057_v12, %v965_v19 }
  0x31   : > { %692 = vrot.lane.b32.xlu1 %v658_v42, %s1810_s28  ;;  %676 = vrot.lane.b32.xlu0 %v638_v43, %s1810_s28 }
  0x35   : > { %369 = vrot.lane.b32.xlu1 %v658_v42, %s1807_s25  ;;  %353 = vrot.lane.b32.xlu0 %v638_v43, %s1807_s25  ;;  %v1191_v42 = vld [vmem:[%s2524_s1 + $0x18] sm:$0xff] }
  0x36   : > { %v1708_v43 = vpack.c.bf16 %v1191_v42, %v1190_v41 }
  0x39   : > { %694 = vrot.lane.b32.xlu1 %v660_v52, %s1810_s28  ;;  %678 = vrot.lane.b32.xlu0 %v640_v53, %s1810_s28  ;;  %v1071_v52 = vsel %vm414_vm2, %v2083_v30, %v1070_v48  ;;  %v342_v53 = vrot.slane %v263_v49, 1 }
  0x3b   : > { %v343_v55 = vsel %vm308_vm1, %v2054_v11, %v342_v53 }
  0x3d   : > { %797 = vrot.lane.b32.xlu1 %v763_v56, %s1811_s29  ;;  %781 = vrot.lane.b32.xlu0 %v743_v57, %s1811_s29 }
  0x41   : > { %371 = vrot.lane.b32.xlu1 %v338_v60, %s1807_s25  ;;  %355 = vrot.lane.b32.xlu0 %v318_v61, %s1807_s25  ;;  %v750_v60 = vsel %vm414_vm2, %v2083_v30, %v749_v58  ;;  %v448_v61 = vrot.slane %v263_v49, 2  ;;  %v254_v58 = vld [vmem:[%s1874_s24 + $0x58] sm:$0x3] }
  0x42   : > { %v327_v62 = vrot.slane %v254_v58, 1 }
  0x45   : > { %475 = vrot.lane.b32.xlu1 %v763_v56, %s1808_s26  ;;  %459 = vrot.lane.b32.xlu0 %v743_v57, %s1808_s26  ;;  %v323_v56 = vsel %vm308_vm1, %v2057_v12, %v322_v54  ;;  %v2169_v12 = vrot.slane %v1978_v34, 1 }
  0x47   : > { %v989_v16 = vsel %vm308_vm1, %v987_v9, %v2169_v12 }
  0x49   : > { %799 = vrot.lane.b32.xlu1 %v765_v0, %s1811_s29  ;;  %783 = vrot.lane.b32.xlu0 %v745_v1, %s1811_s29  ;;  %v449_v1 = vsel %vm414_vm2, %v2080_v24, %v448_v61 }
  0x4d   : > { %905 = vrot.lane.b32.xlu1 %v1925_v20, %s1812_s30  ;;  %889 = vrot.lane.b32.xlu0 %v1944_v25, %s1812_s30 }
  0x51   : > { %477 = vrot.lane.b32.xlu1 %v444_v4, %s1808_s26  ;;  %461 = vrot.lane.b32.xlu0 %v424_v5, %s1808_s26 }
  0x55   : > { %583 = vrot.lane.b32.xlu1 %v1925_v20, %s1809_s27  ;;  %567 = vrot.lane.b32.xlu0 %v1944_v25, %s1809_s27  ;;  %v1089_v20 = vsel %vm414_vm2, %v1087_v21, %v2080_v24  ;;  %v1069_v25 = vsel %vm414_vm2, %v1067_v23, %v2083_v30  ;;  %v2189_v30 = vld [vmem:[%s1874_s24 + $0xb8] sm:$0x3] }
  0x56   : > { %v1095_v53 = vrot.slane %v2189_v30, 2 }
  0x59   : > { %907 = vrot.lane.b32.xlu1 %v1947_v26, %s1812_s30  ;;  %891 = vrot.lane.b32.xlu0 %v1950_v27, %s1812_s30 }
  0x5d   : > { %1018 = vrot.lane.b32.xlu1 %v984_v13, %s1813_s4  ;;  %1002 = vrot.lane.b32.xlu0 %v964_v14, %s1813_s4 }
  0x61   : > { %585 = vrot.lane.b32.xlu1 %v1947_v26, %s1809_s27  ;;  %569 = vrot.lane.b32.xlu0 %v1950_v27, %s1809_s27  ;;  %v1596_v26 = vld [vmem:[%s1874_s24 + $0xa0] sm:$0x3] }
  0x62   : > { %v1188_v27 = vld [vmem:[%s2524_s1] sm:$0xff]  ;;  %v664_v39 = vrot.slane %v1596_v26, 1  ;;  %v769_v57 = vrot.slane %v1596_v26, 2 }
  0x63   : > { %v1704_v38 = vpack.c.bf16 %v1189_v37, %v1188_v27  ;;  %v1072_v27 = vrot.slane %v1973_v33, 2  ;;  %v2209_v37 = vrot.slane %v1978_v34, 2 }
  0x64   : > { %v665_v44 = vsel %vm308_vm1, %v2054_v11, %v664_v39  ;;  %v770_v59 = vsel %vm414_vm2, %v2080_v24, %v769_v57  ;;  %v967_v11 = vrot.slane %v1973_v33, 1  ;;  %v266_v57 = vld [vmem:[%s1874_s24 + $0xb8] sm:$0x3] }
  0x65   : > { %696 = vrot.lane.b32.xlu1 %v984_v13, %s1810_s28  ;;  %680 = vrot.lane.b32.xlu0 %v964_v14, %s1810_s28  ;;  %v347_v61 = vrot.slane %v266_v57, 1 }
  0x66   : > { %1705 = vmatprep.subr.bf16.mxu0 %v1704_v38  ;;  %1712 = vmatprep.subr.bf16.mxu1 %v1704_v38 }
  0x67   : > { %1707 = vmatpush3.bf16.msra.mxu0 %v1704_v38  ;;  %1715 = vmatpush3.bf16.msra.mxu1 %v1704_v38  ;;  %v2212_v38 = vrot.slane %v1981_v35, 2 }
  0x68   : > { %1709 = vmatprep.subr.bf16.mxu0 %v1708_v43  ;;  %1713 = vmatprep.subr.bf16.mxu1 %v1708_v43 }
  0x69   : > { %1020 = vrot.lane.b32.xlu1 %v986_v31, %s1813_s4  ;;  %1004 = vrot.lane.b32.xlu0 %v966_v32, %s1813_s4  ;;  %v2192_v31 = vld [vmem:[%s1874_s24 + $0x58] sm:$0x3]  ;;  %v990_v32 = vrot.slane %v2189_v30, 1 }
  0x6a   : > { %v1075_v54 = vrot.slane %v2192_v31, 2 }
  0x6b   : > { %1711 = vmatpush3.bf16.msra.mxu0 %v1708_v43  ;;  %1716 = vmatpush3.bf16.msra.mxu1 %v1708_v43  ;;  %v991_v39 = vsel %vm308_vm1, %v2169_v12, %v990_v32  ;;  %v1599_v43 = vld [vmem:[%s1874_s24 + $0xb8] sm:$0x3] }
  0x6c   : > { %1678 = vmatprep.subr.msk.mxu0 %vm1249_vm3, %v1192_v46  ;;  %1714 = vmatprep.subr.msk.mxu1 %vm1249_vm3, %v1192_v46 }
  0x6d   : > { %1123 = vrot.lane.b32.xlu1 %v1089_v20, %s1814_s9  ;;  %1107 = vrot.lane.b32.xlu0 %v1069_v25, %s1814_s9 }
  0x6f   : > { %1679 = vmatpush3.msk.msra.mxu0 %vm1249_vm3, %v1192_v46  ;;  %1717 = vmatpush3.msk.msra.mxu1 %vm1249_vm3, %v1192_v46 }
  0x71   : > { %373 = vrot.lane.b32.xlu1 %v984_v13, %s1807_s25  ;;  %357 = vrot.lane.b32.xlu0 %v964_v14, %s1807_s25  ;;  %v2172_v13 = vrot.slane %v1981_v35, 1 }
  0x73   : > { %v969_v17 = vsel %vm308_vm1, %v967_v11, %v2172_v13 }
  0x75   : > { %698 = vrot.lane.b32.xlu1 %v665_v44, %s1810_s28  ;;  %682 = vrot.lane.b32.xlu0 %v645_v45, %s1810_s28  ;;  %v1587_v44 = vld [vmem:[%s1874_s24 + $0x58] sm:$0x3]  ;;  %v669_v45 = vrot.slane %v1599_v43, 1 }
  0x76   : > { %v649_v46 = vrot.slane %v1587_v44, 1 }
  0x77   : > { %v670_v49 = vsel %vm308_vm1, %v2169_v12, %v669_v45 }
  0x78   : > { %v650_v50 = vsel %vm308_vm1, %v2172_v13, %v649_v46 }
  0x79   : > { %801 = vrot.lane.b32.xlu1 %v1089_v20, %s1811_s29  ;;  %785 = vrot.lane.b32.xlu0 %v1069_v25, %s1811_s29 }
  0x7d   : > { %1125 = vrot.lane.b32.xlu1 %v1091_v51, %s1814_s9  ;;  %1109 = vrot.lane.b32.xlu0 %v1071_v52, %s1814_s9 }
  0x81   : > { %375 = vrot.lane.b32.xlu1 %v343_v55, %s1807_s25  ;;  %359 = vrot.lane.b32.xlu0 %v323_v56, %s1807_s25 }
  0x85   : > { %479 = vrot.lane.b32.xlu1 %v1089_v20, %s1808_s26  ;;  %463 = vrot.lane.b32.xlu0 %v1069_v25, %s1808_s26  ;;  %v970_v20 = vrot.slane %v2192_v31, 1 }
  0x89   : > { %803 = vrot.lane.b32.xlu1 %v770_v59, %s1811_s29  ;;  %787 = vrot.lane.b32.xlu0 %v750_v60, %s1811_s29  ;;  %v1096_v59 = vsel %vm414_vm2, %v2209_v37, %v1095_v53  ;;  %v1076_v60 = vsel %vm414_vm2, %v2212_v38, %v1075_v54  ;;  %v1590_v53 = vld [vmem:[%s1874_s24 + $0x70] sm:$0x3] }
  0x8b   : > { %v352_v63 = vpop.permute.xlu1 %351  ;;  %v350_v0 = vpop.permute.xlu0 %349 }
  0x8c   : > { %399 = vst.msk [vmem:[#allocation2 + $0x8] sm:$0xff] %vm397_vm4, %v352_v63  ;;  %398 = vst.msk [vmem:[#allocation2] sm:$0xff] %vm397_vm4, %v350_v0 }
  0x8d   : > { %909 = vrot.lane.b32.xlu1 %v1957_v28, %s1812_s30  ;;  %893 = vrot.lane.b32.xlu0 %v1973_v33, %s1812_s30 }
  0x8f   : > { %v368_v3 = vpop.permute.xlu1 %367  ;;  %v366_v4 = vpop.permute.xlu0 %365 }
  0x90   : > { %407 = vst.msk [vmem:[#allocation2 + $0x48] sm:$0xff] %vm397_vm4, %v368_v3  ;;  %406 = vst.msk [vmem:[#allocation2 + $0x40] sm:$0xff] %vm397_vm4, %v366_v4 }
  0x91   : > { %481 = vrot.lane.b32.xlu1 %v449_v1, %s1808_s26  ;;  %465 = vrot.lane.b32.xlu0 %v429_v2, %s1808_s26  ;;  %v348_v1 = vsel %vm308_vm1, %v2169_v12, %v347_v61  ;;  %v328_v2 = vsel %vm308_vm1, %v2172_v13, %v327_v62 }
  0x93   : > { %v472_v5 = vpop.permute.xlu1 %471  ;;  %v456_v7 = vpop.permute.xlu0 %455 }
  0x94   : > { %512 = vst.msk [vmem:[#allocation2 + $0x40] sm:$0xff] %vm503_vm5, %v472_v5  ;;  %504 = vst.msk [vmem:[#allocation2] sm:$0xff] %vm503_vm5, %v456_v7  ;;  %v774_v5 = vrot.slane %v1599_v43, 2  ;;  %v754_v7 = vrot.slane %v1587_v44, 2 }
  0x95   : > { %587 = vrot.lane.b32.xlu1 %v1957_v28, %s1809_s27  ;;  %571 = vrot.lane.b32.xlu0 %v1973_v33, %s1809_s27  ;;  %v971_v28 = vsel %vm308_vm1, %v2172_v13, %v970_v20 }
  0x96   : > { %v775_v12 = vsel %vm414_vm2, %v2209_v37, %v774_v5  ;;  %v755_v13 = vsel %vm414_vm2, %v2212_v38, %v754_v7 }
  0x97   : > { %v474_v14 = vpop.permute.xlu1 %473  ;;  %v458_v15 = vpop.permute.xlu0 %457 }
  0x98   : > { %513 = vst.msk [vmem:[#allocation2 + $0x48] sm:$0xff] %vm503_vm5, %v474_v14  ;;  %505 = vst.msk [vmem:[#allocation2 + $0x8] sm:$0xff] %vm503_vm5, %v458_v15 }
  0x99   : > { %911 = vrot.lane.b32.xlu1 %v1978_v34, %s1812_s30  ;;  %895 = vrot.lane.b32.xlu0 %v1981_v35, %s1812_s30 }
  0x9b   : > { %v580_v19 = vpop.permute.xlu1 %579  ;;  %v564_v21 = vpop.permute.xlu0 %563 }
  0x9c   : > { %620 = vst.msk [vmem:[#allocation2 + $0x40] sm:$0xff] %vm611_vm6, %v580_v19  ;;  %612 = vst.msk [vmem:[#allocation2] sm:$0xff] %vm611_vm6, %v564_v21  ;;  %v433_v19 = vrot.slane %v254_v58, 2 }
  0x9d   : > { %1022 = vrot.lane.b32.xlu1 %v989_v16, %s1813_s4  ;;  %1006 = vrot.lane.b32.xlu0 %v969_v17, %s1813_s4 }
  0x9e   : > { %v434_v30 = vsel %vm414_vm2, %v2212_v38, %v433_v19 }
  0x9f   : > { %v582_v23 = vpop.permute.xlu1 %581  ;;  %v566_v24 = vpop.permute.xlu0 %565 }
  0xa0   : > { %621 = vst.msk [vmem:[#allocation2 + $0x48] sm:$0xff] %vm611_vm6, %v582_v23  ;;  %613 = vst.msk [vmem:[#allocation2 + $0x8] sm:$0xff] %vm611_vm6, %v566_v24 }
  0xa1   : > { %589 = vrot.lane.b32.xlu1 %v1978_v34, %s1809_s27  ;;  %573 = vrot.lane.b32.xlu0 %v1981_v35, %s1809_s27  ;;  %v1094_v34 = vsel %vm414_vm2, %v1092_v36, %v2209_v37  ;;  %v1074_v35 = vsel %vm414_vm2, %v1072_v27, %v2212_v38 }
  0xa3   : > { %v693_v25 = vpop.permute.xlu1 %692  ;;  %v677_v26 = vpop.permute.xlu0 %676 }
  0xa4   : > { %733 = vst.msk [vmem:[#allocation2 + $0x40] sm:$0xff] %vm724_vm7, %v693_v25  ;;  %725 = vst.msk [vmem:[#allocation2] sm:$0xff] %vm724_vm7, %v677_v26  ;;  %v1624_v26 = vld [vmem:[%s1874_s24 + $0xc8] sm:$0xff] }
  0xa5   : > { %700 = vrot.lane.b32.xlu1 %v989_v16, %s1810_s28  ;;  %684 = vrot.lane.b32.xlu0 %v969_v17, %s1810_s28  ;;  %v993_v27 = vrot.slane %v1624_v26, 1  ;;  %v1098_v46 = vrot.slane %v1624_v26, 2 }
  0xa7   : > { %v370_v40 = vpop.permute.xlu1 %369  ;;  %v354_v33 = vpop.permute.xlu0 %353 }
  0xa8   : > { %408 = vst.msk [vmem:[#allocation2 + $0x50] sm:$0xff] %vm397_vm4, %v370_v40  ;;  %400 = vst.msk [vmem:[#allocation2 + $0x10] sm:$0xff] %vm397_vm4, %v354_v33 }
  0xa9   : > { %1024 = vrot.lane.b32.xlu1 %v991_v39, %s1813_s4  ;;  %1008 = vrot.lane.b32.xlu0 %v971_v28, %s1813_s4 }
  0xab   : > { %v695_v41 = vpop.permute.xlu1 %694  ;;  %v679_v42 = vpop.permute.xlu0 %678 }
  0xac   : > { %734 = vst.msk [vmem:[#allocation2 + $0x48] sm:$0xff] %vm724_vm7, %v695_v41  ;;  %726 = vst.msk [vmem:[#allocation2 + $0x8] sm:$0xff] %vm724_vm7, %v679_v42 }
  0xad   : > { %1127 = vrot.lane.b32.xlu1 %v1094_v34, %s1814_s9  ;;  %1111 = vrot.lane.b32.xlu0 %v1074_v35, %s1814_s9 }
  0xaf   : > { %v798_v47 = vpop.permute.xlu1 %797  ;;  %v782_v48 = vpop.permute.xlu0 %781 }
  0xb0   : > { %838 = vst.msk [vmem:[#allocation2 + $0x40] sm:$0xff] %vm829_vm8, %v798_v47  ;;  %830 = vst.msk [vmem:[#allocation2] sm:$0xff] %vm829_vm8, %v782_v48  ;;  %v1602_v48 = vld [vmem:[%s1874_s24 + $0xd0] sm:$0x3] }
  0xb1   : > { %377 = vrot.lane.b32.xlu1 %v989_v16, %s1807_s25  ;;  %361 = vrot.lane.b32.xlu0 %v969_v17, %s1807_s25  ;;  %v2281_v16 = vld [vmem:[%s1874_s24 + $0xc0] sm:$0xff]  ;;  %v453_v17 = vrot.slane %v266_v57, 2  ;;  %v674_v54 = vrot.slane %v1602_v48, 1 }
  0xb2   : > { %v992_v36 = vrot.slane %v2281_v16, 1  ;;  %v1097_v45 = vrot.slane %v2281_v16, 2 }
  0xb3   : > { %v372_v51 = vpop.permute.xlu1 %371  ;;  %v356_v52 = vpop.permute.xlu0 %355  ;;  %v454_v24 = vsel %vm414_vm2, %v2209_v37, %v453_v17  ;;  %v675_v58 = vsel %vm308_vm1, %v993_v27, %v674_v54 }
  0xb4   : > { %409 = vst.msk [vmem:[#allocation2 + $0x58] sm:$0xff] %vm397_vm4, %v372_v51  ;;  %401 = vst.msk [vmem:[#allocation2 + $0x18] sm:$0xff] %vm397_vm4, %v356_v52  ;;  %v994_v39 = vsel %vm308_vm1, %v992_v36, %v993_v27 }
  0xb5   : > { %702 = vrot.lane.b32.xlu1 %v670_v49, %s1810_s28  ;;  %686 = vrot.lane.b32.xlu0 %v650_v50, %s1810_s28 }
  0xb7   : > { %v476_v55 = vpop.permute.xlu1 %475  ;;  %v460_v56 = vpop.permute.xlu0 %459 }
  0xb8   : > { %514 = vst.msk [vmem:[#allocation2 + $0x50] sm:$0xff] %vm503_vm5, %v476_v55  ;;  %506 = vst.msk [vmem:[#allocation2 + $0x10] sm:$0xff] %vm503_vm5, %v460_v56  ;;  %v654_v55 = vrot.slane %v1590_v53, 1 }
  0xb9   : > { %805 = vrot.lane.b32.xlu1 %v1094_v34, %s1811_s29  ;;  %789 = vrot.lane.b32.xlu0 %v1074_v35, %s1811_s29 }
  0xbb   : > { %v800_v63 = vpop.permute.xlu1 %799  ;;  %v784_v0 = vpop.permute.xlu0 %783 }
  0xbc   : > { %839 = vst.msk [vmem:[#allocation2 + $0x48] sm:$0xff] %vm829_vm8, %v800_v63  ;;  %831 = vst.msk [vmem:[#allocation2 + $0x8] sm:$0xff] %vm829_vm8, %v784_v0 }
  0xbd   : > { %1129 = vrot.lane.b32.xlu1 %v1096_v59, %s1814_s9  ;;  %1113 = vrot.lane.b32.xlu0 %v1076_v60, %s1814_s9  ;;  %v655_v59 = vsel %vm308_vm1, %v1893_v8, %v654_v55 }
  0xbf   : > { %v906_v3 = vpop.permute.xlu1 %905  ;;  %v890_v4 = vpop.permute.xlu0 %889 }
  0xc0   : > { %946 = vst.msk [vmem:[#allocation2 + $0x40] sm:$0xff] %vm937_vm9, %v906_v3  ;;  %938 = vst.msk [vmem:[#allocation2] sm:$0xff] %vm937_vm9, %v890_v4  ;;  %v779_v3 = vrot.slane %v1602_v48, 2  ;;  %v759_v4 = vrot.slane %v1590_v53, 2 }
  0xc1   : > { %379 = vrot.lane.b32.xlu1 %v348_v1, %s1807_s25  ;;  %363 = vrot.lane.b32.xlu0 %v328_v2, %s1807_s25 }
  0xc3   : > { %v478_v9 = vpop.permute.xlu1 %477  ;;  %v462_v11 = vpop.permute.xlu0 %461 }
  0xc4   : > { %515 = vst.msk [vmem:[#allocation2 + $0x58] sm:$0xff] %vm503_vm5, %v478_v9  ;;  %507 = vst.msk [vmem:[#allocation2 + $0x18] sm:$0xff] %vm503_vm5, %v462_v11 }
  0xc5   : > { %483 = vrot.lane.b32.xlu1 %v1094_v34, %s1808_s26  ;;  %467 = vrot.lane.b32.xlu0 %v1074_v35, %s1808_s26  ;;  %v1625_v34 = vld [vmem:[%s1874_s24 + $0xd0] sm:$0x3] }
  0xc6   : > { %v1613_v35 = vld [vmem:[%s1874_s24 + $0x70] sm:$0x3]  ;;  %v995_v41 = vrot.slane %v1625_v34, 1  ;;  %v1100_v62 = vrot.slane %v1625_v34, 2 }
  0xc7   : > { %v584_v14 = vpop.permute.xlu1 %583  ;;  %v568_v15 = vpop.permute.xlu0 %567  ;;  %v975_v42 = vrot.slane %v1613_v35, 1  ;;  %v1080_v63 = vrot.slane %v1613_v35, 2 }
  0xc8   : > { %622 = vst.msk [vmem:[#allocation2 + $0x50] sm:$0xff] %vm611_vm6, %v584_v14  ;;  %614 = vst.msk [vmem:[#allocation2 + $0x10] sm:$0xff] %vm611_vm6, %v568_v15  ;;  %v1626_v15 = vld [vmem:[%s1874_s24 + $0xd8] sm:$0xff] }
  0xc9   : > { %807 = vrot.lane.b32.xlu1 %v775_v12, %s1811_s29  ;;  %791 = vrot.lane.b32.xlu0 %v755_v13, %s1811_s29  ;;  %v976_v47 = vsel %vm308_vm1, %v1893_v8, %v975_v42  ;;  %v1101_v8 = vsel %vm414_vm2, %v1098_v46, %v1100_v62  ;;  %v1081_v2 = vsel %vm414_vm2, %v1922_v18, %v1080_v63 }
  0xca   : > { %v760_v12 = vsel %vm414_vm2, %v1922_v18, %v759_v4  ;;  %v997_v18 = vrot.slane %v1626_v15, 1 }
  0xcb   : > { %v908_v21 = vpop.permute.xlu1 %907  ;;  %v892_v23 = vpop.permute.xlu0 %891 }
  0xcc   : > { %947 = vst.msk [vmem:[#allocation2 + $0x48] sm:$0xff] %vm937_vm9, %v908_v21  ;;  %939 = vst.msk [vmem:[#allocation2 + $0x8] sm:$0xff] %vm937_vm9, %v892_v23  ;;  %v1627_v21 = vld [vmem:[%s1874_s24 + $0xe0] sm:$0xff] }
  0xcd   : > { %913 = vrot.lane.b32.xlu1 %v2281_v16, %s1812_s30  ;;  %897 = vrot.lane.b32.xlu0 %v1896_v10, %s1812_s30  ;;  %v1615_v23 = vld [vmem:[%s1874_s24 + $0x80] sm:$0xff] }
  0xce   : > { %v1083_v34 = vrot.slane %v1615_v23, 2 }
  0xcf   : > { %v1019_v31 = vpop.permute.xlu1 %1018  ;;  %v1003_v32 = vpop.permute.xlu0 %1002 }
  0xd0   : > { %1059 = vst.msk [vmem:[#allocation2 + $0x40] sm:$0xff] %vm1050_vm10, %v1019_v31  ;;  %1051 = vst.msk [vmem:[#allocation2] sm:$0xff] %vm1050_vm10, %v1003_v32  ;;  %v978_v31 = vrot.slane %v1615_v23, 1 }
  0xd1   : > { %485 = vrot.lane.b32.xlu1 %v454_v24, %s1808_s26  ;;  %469 = vrot.lane.b32.xlu0 %v434_v30, %s1808_s26  ;;  %v998_v30 = vrot.slane %v1627_v21, 1 }
  0xd3   : > { %v586_v20 = vpop.permute.xlu1 %585  ;;  %v570_v25 = vpop.permute.xlu0 %569  ;;  %v999_v36 = vsel %vm308_vm1, %v997_v18, %v998_v30 }
  0xd4   : > { %623 = vst.msk [vmem:[#allocation2 + $0x58] sm:$0xff] %vm611_vm6, %v586_v20  ;;  %615 = vst.msk [vmem:[#allocation2 + $0x18] sm:$0xff] %vm611_vm6, %v570_v25  ;;  %v1628_v25 = vld [vmem:[%s1874_s24 + $0xe8] sm:$0x3] }
  0xd5   : > { %591 = vrot.lane.b32.xlu1 %v2281_v16, %s1809_s27  ;;  %575 = vrot.lane.b32.xlu0 %v1896_v10, %s1809_s27  ;;  %v1614_v16 = vld [vmem:[%s1874_s24 + $0x78] sm:$0xff] }
  0xd6   : > { %v977_v24 = vrot.slane %v1614_v16, 1 }
  0xd7   : > { %v697_v37 = vpop.permute.xlu1 %696  ;;  %v681_v38 = vpop.permute.xlu0 %680 }
  0xd8   : > { %735 = vst.msk [vmem:[#allocation2 + $0x50] sm:$0xff] %vm724_vm7, %v697_v37  ;;  %727 = vst.msk [vmem:[#allocation2 + $0x10] sm:$0xff] %vm724_vm7, %v681_v38  ;;  %v1000_v37 = vrot.slane %v1628_v25, 1 }
  0xd9   : > { %915 = vrot.lane.b32.xlu1 %v1624_v26, %s1812_s30  ;;  %899 = vrot.lane.b32.xlu0 %v1886_v6, %s1812_s30 }
  0xda   : > { %v1001_v35 = vsel %vm308_vm1, %v998_v30, %v1000_v37 }
  0xdb   : > { %v1021_v28 = vpop.permute.xlu1 %1020  ;;  %v1005_v10 = vpop.permute.xlu0 %1004 }
  0xdc   : > { %1060 = vst.msk [vmem:[#allocation2 + $0x48] sm:$0xff] %vm1050_vm10, %v1021_v28  ;;  %1052 = vst.msk [vmem:[#allocation2 + $0x8] sm:$0xff] %vm1050_vm10, %v1005_v10  ;;  %v1102_v10 = vrot.slane %v1626_v15, 2 }
  0xdd   : > { %1026 = vrot.lane.b32.xlu1 %v994_v39, %s1813_s4  ;;  %1010 = vrot.lane.b32.xlu0 %v1937_v22, %s1813_s4 }
  0xdf   : > { %v1124_v40 = vpop.permute.xlu1 %1123  ;;  %v1108_v33 = vpop.permute.xlu0 %1107 }
  0xe0   : > { %1164 = vst.msk [vmem:[#allocation2 + $0x40] sm:$0xff] %vm1155_vm11, %v1124_v40  ;;  %1156 = vst.msk [vmem:[#allocation2] sm:$0xff] %vm1155_vm11, %v1108_v33  ;;  %v1082_v40 = vrot.slane %v1614_v16, 2  ;;  %v1103_v33 = vrot.slane %v1627_v21, 2 }
  0xe1   : > { %593 = vrot.lane.b32.xlu1 %v1624_v26, %s1809_s27  ;;  %577 = vrot.lane.b32.xlu0 %v1886_v6, %s1809_s27  ;;  %v996_v6 = vsel %vm308_vm1, %v993_v27, %v995_v41  ;;  %v1616_v26 = vld [vmem:[%s1874_s24 + $0x88] sm:$0x3]  ;;  %v979_v27 = vsel %vm308_vm1, %v977_v24, %v978_v31  ;;  %s1573_s24 = sshll.u32 %s2538_s13, 5 }
  0xe2   : > { %v980_v38 = vrot.slane %v1616_v26, 1  ;;  %s236_s25 = sadd.s32 %s1573_s24, %s2540_s23 }
  0xe3   : > { %v374_v43 = vpop.permute.xlu1 %373  ;;  %v358_v44 = vpop.permute.xlu0 %357 }
  0xe4   : > { %410 = vst.msk [vmem:[#allocation2 + $0x60] sm:$0xff] %vm397_vm4, %v374_v43  ;;  %402 = vst.msk [vmem:[#allocation2 + $0x20] sm:$0xff] %vm397_vm4, %v358_v44  ;;  %v981_v41 = vsel %vm308_vm1, %v978_v31, %v980_v38  ;;  %v1104_v44 = vsel %vm414_vm2, %v1102_v10, %v1103_v33 }
  0xe5   : > { %704 = vrot.lane.b32.xlu1 %v994_v39, %s1810_s28  ;;  %688 = vrot.lane.b32.xlu0 %v1937_v22, %s1810_s28  ;;  %v1099_v22 = vsel %vm414_vm2, %v1097_v45, %v1098_v46  ;;  %v1084_v45 = vsel %vm414_vm2, %v1082_v40, %v1083_v34 }
  0xe7   : > { %v699_v49 = vpop.permute.xlu1 %698  ;;  %v683_v50 = vpop.permute.xlu0 %682  ;;  %v1172_v51 = vld [vmem:[#allocation2] sm:$0xff] }
  0xe8   : > { %v1180_v52 = vld [vmem:[#allocation2 + $0x40] sm:$0xff]  ;;  %736 = vst.msk [vmem:[#allocation2 + $0x58] sm:$0xff] %vm724_vm7, %v699_v49  ;;  %728 = vst.msk [vmem:[#allocation2 + $0x18] sm:$0xff] %vm724_vm7, %v683_v50  ;;  %1680 = vmatprep.mubr.msk.f32.mxu0 %vm1200_vm12, %v1172_v51 }
  0xe9   : > { %1692 = vmatprep.mubr.msk.f32.mxu1 %vm1200_vm12, %v1180_v52  ;;  %1028 = vrot.lane.b32.xlu1 %v996_v6, %s1813_s4  ;;  %v1085_v6 = vrot.slane %v1616_v26, 2 }
  0xea   : > { %1012 = vrot.lane.b32.xlu0 %v976_v47, %s1813_s4 }
  0xeb   : > { %v802_v56 = vpop.permute.xlu1 %801  ;;  %v786_v57 = vpop.permute.xlu0 %785  ;;  %v1086_v50 = vsel %vm414_vm2, %v1083_v34, %v1085_v6 }
  0xec   : > { %840 = vst.msk [vmem:[#allocation2 + $0x50] sm:$0xff] %vm829_vm8, %v802_v56  ;;  %832 = vst.msk [vmem:[#allocation2 + $0x10] sm:$0xff] %vm829_vm8, %v786_v57 }
  0xed   : > { %1131 = vrot.lane.b32.xlu1 %v1099_v22, %s1814_s9 }
  0xee   : > { %1115 = vrot.lane.b32.xlu0 %v1968_v29, %s1814_s9 }
  0xef   : > { %v1126_v60 = vpop.permute.xlu1 %1125  ;;  %v1110_v61 = vpop.permute.xlu0 %1109 }
  0xf0   : > { %1165 = vst.msk [vmem:[#allocation2 + $0x48] sm:$0xff] %vm1155_vm11, %v1126_v60  ;;  %1157 = vst.msk [vmem:[#allocation2 + $0x8] sm:$0xff] %vm1155_vm11, %v1110_v61 }
  0xf1   : > { %706 = vrot.lane.b32.xlu1 %v675_v58, %s1810_s28 }
  0xf2   : > { %690 = vrot.lane.b32.xlu0 %v655_v59, %s1810_s28  ;;  %s1574_s28 = sshll.u32 %s236_s25, 3 }
  0xf3   : > { %v376_v0 = vpop.permute.xlu1 %375  ;;  %v360_v1 = vpop.permute.xlu0 %359 }
  0xf4   : > { %411 = vst.msk [vmem:[#allocation2 + $0x68] sm:$0xff] %vm397_vm4, %v376_v0  ;;  %403 = vst.msk [vmem:[#allocation2 + $0x28] sm:$0xff] %vm397_vm4, %v360_v1 }
  0xf5   : > { %809 = vrot.lane.b32.xlu1 %v1099_v22, %s1811_s29 }
  0xf6   : > { %793 = vrot.lane.b32.xlu0 %v1968_v29, %s1811_s29  ;;  %v780_v29 = vsel %vm414_vm2, %v1098_v46, %v779_v3  ;;  %v1105_v46 = vrot.slane %v1628_v25, 2 }
  0xf7   : > { %v480_v5 = vpop.permute.xlu1 %479  ;;  %v464_v7 = vpop.permute.xlu0 %463  ;;  %v1173_v9 = vld [vmem:[#allocation2 + $0x8] sm:$0xff] }
  0xf8   : > { %v1181_v11 = vld [vmem:[#allocation2 + $0x48] sm:$0xff]  ;;  %516 = vst.msk [vmem:[#allocation2 + $0x60] sm:$0xff] %vm503_vm5, %v480_v5  ;;  %508 = vst.msk [vmem:[#allocation2 + $0x20] sm:$0xff] %vm503_vm5, %v464_v7  ;;  %1681 = vmatmul.mubr.msk.f32.vlgmr.msra.gmra.mrb[0].mxu0 %vm1200_vm12, %v1173_v9  ;;  %v1106_v49 = vsel %vm414_vm2, %v1103_v33, %v1105_v46 }
  0xf9   : > { %1693 = vmatmul.mubr.msk.f32.vlgmr.msra.gmra.mrb[0].mxu1 %vm1200_vm12, %v1181_v11  ;;  %1133 = vrot.lane.b32.xlu1 %v1101_v8, %s1814_s9 }
  0xfa   : > { %1117 = vrot.lane.b32.xlu0 %v1081_v2, %s1814_s9 }
  0xfb   : > { %v804_v13 = vpop.permute.xlu1 %803  ;;  %v788_v14 = vpop.permute.xlu0 %787 }
  0xfc   : > { %841 = vst.msk [vmem:[#allocation2 + $0x58] sm:$0xff] %vm829_vm8, %v804_v13  ;;  %833 = vst.msk [vmem:[#allocation2 + $0x18] sm:$0xff] %vm829_vm8, %v788_v14 }
  0xfd   : > { %811 = vrot.lane.b32.xlu1 %v780_v29, %s1811_s29 }
  0xfe   : > { %795 = vrot.lane.b32.xlu0 %v760_v12, %s1811_s29 }
  0xff   : > { %v910_v17 = vpop.permute.xlu1 %909  ;;  %v894_v19 = vpop.permute.xlu0 %893 }
 0x100   : > { %948 = vst.msk [vmem:[#allocation2 + $0x50] sm:$0xff] %vm937_vm9, %v910_v17  ;;  %940 = vst.msk [vmem:[#allocation2 + $0x10] sm:$0xff] %vm937_vm9, %v894_v19 }
 0x101   : > { %917 = vrot.lane.b32.xlu1 %v1626_v15, %s1812_s30 }
 0x102   : > { %901 = vrot.lane.b32.xlu0 %v1614_v16, %s1812_s30 }
 0x103   : > { %v482_v32 = vpop.permute.xlu1 %481  ;;  %v466_v20 = vpop.permute.xlu0 %465 }
 0x104   : > { %517 = vst.msk [vmem:[#allocation2 + $0x68] sm:$0xff] %vm503_vm5, %v482_v32  ;;  %509 = vst.msk [vmem:[#allocation2 + $0x28] sm:$0xff] %vm503_vm5, %v466_v20 }
 0x105   : > { %919 = vrot.lane.b32.xlu1 %v1627_v21, %s1812_s30 }
 0x106   : > { %903 = vrot.lane.b32.xlu0 %v1615_v23, %s1812_s30 }
 0x107   : > { %v588_v39 = vpop.permute.xlu1 %587  ;;  %v572_v28 = vpop.permute.xlu0 %571 }
 0x108   : > { %624 = vst.msk [vmem:[#allocation2 + $0x60] sm:$0xff] %vm611_vm6, %v588_v39  ;;  %616 = vst.msk [vmem:[#allocation2 + $0x20] sm:$0xff] %vm611_vm6, %v572_v28 }
 0x109   : > { %1030 = vrot.lane.b32.xlu1 %v999_v36, %s1813_s4 }
 0x10a   : > { %1014 = vrot.lane.b32.xlu0 %v979_v27, %s1813_s4 }
 0x10b   : > { %v912_v42 = vpop.permute.xlu1 %911  ;;  %v896_v43 = vpop.permute.xlu0 %895 }
 0x10c   : > { %949 = vst.msk [vmem:[#allocation2 + $0x58] sm:$0xff] %vm937_vm9, %v912_v42  ;;  %941 = vst.msk [vmem:[#allocation2 + $0x18] sm:$0xff] %vm937_vm9, %v896_v43 }
 0x10d   : > { %1032 = vrot.lane.b32.xlu1 %v1001_v35, %s1813_s4 }
 0x10e   : > { %1016 = vrot.lane.b32.xlu0 %v981_v41, %s1813_s4  ;;  %s2490_s4 = scalar_lea.vmem %s2526_s3, %s1574_s28 }
 0x10f   : > { %v1023_v47 = vpop.permute.xlu1 %1022  ;;  %v1007_v48 = vpop.permute.xlu0 %1006 }
 0x110   : > { %1061 = vst.msk [vmem:[#allocation2 + $0x50] sm:$0xff] %vm1050_vm10, %v1023_v47  ;;  %1053 = vst.msk [vmem:[#allocation2 + $0x10] sm:$0xff] %vm1050_vm10, %v1007_v48 }
 0x111   : > { %1135 = vrot.lane.b32.xlu1 %v1104_v44, %s1814_s9 }
 0x112   : > { %1119 = vrot.lane.b32.xlu0 %v1084_v45, %s1814_s9 }
 0x113   : > { %v590_v51 = vpop.permute.xlu1 %589  ;;  %v574_v52 = vpop.permute.xlu0 %573 }
 0x114   : > { %625 = vst.msk [vmem:[#allocation2 + $0x68] sm:$0xff] %vm611_vm6, %v590_v51  ;;  %617 = vst.msk [vmem:[#allocation2 + $0x28] sm:$0xff] %vm611_vm6, %v574_v52 }
 0x115   : > { %1137 = vrot.lane.b32.xlu1 %v1106_v49, %s1814_s9 }
 0x116   : > { %1121 = vrot.lane.b32.xlu0 %v1086_v50, %s1814_s9 }
 0x117   : > { %v701_v53 = vpop.permute.xlu1 %700  ;;  %v685_v22 = vpop.permute.xlu0 %684 }
 0x118   : > { %737 = vst.msk [vmem:[#allocation2 + $0x60] sm:$0xff] %vm724_vm7, %v701_v53  ;;  %729 = vst.msk [vmem:[#allocation2 + $0x20] sm:$0xff] %vm724_vm7, %v685_v22 }
 0x11b   : > { %v1025_v54 = vpop.permute.xlu1 %1024  ;;  %v1009_v55 = vpop.permute.xlu0 %1008 }
 0x11c   : > { %1062 = vst.msk [vmem:[#allocation2 + $0x58] sm:$0xff] %vm1050_vm10, %v1025_v54  ;;  %1054 = vst.msk [vmem:[#allocation2 + $0x18] sm:$0xff] %vm1050_vm10, %v1009_v55 }
 0x11f   : > { %v1128_v56 = vpop.permute.xlu1 %1127  ;;  %v1112_v57 = vpop.permute.xlu0 %1111 }
 0x120   : > { %1166 = vst.msk [vmem:[#allocation2 + $0x50] sm:$0xff] %vm1155_vm11, %v1128_v56  ;;  %1158 = vst.msk [vmem:[#allocation2 + $0x10] sm:$0xff] %vm1155_vm11, %v1112_v57 }
 0x123   : > { %v378_v58 = vpop.permute.xlu1 %377  ;;  %v362_v59 = vpop.permute.xlu0 %361 }
 0x124   : > { %412 = vst.msk [vmem:[#allocation2 + $0x70] sm:$0xff] %vm397_vm4, %v378_v58  ;;  %404 = vst.msk [vmem:[#allocation2 + $0x30] sm:$0xff] %vm397_vm4, %v362_v59  ;;  %v1629_v58 = vld [vmem:[%s2525_s2] ss:$0 sm:$0xff] }
 0x127   : > { %v703_v60 = vpop.permute.xlu1 %702  ;;  %v687_v61 = vpop.permute.xlu0 %686  ;;  %v1174_v62 = vld [vmem:[#allocation2 + $0x10] sm:$0xff] }
 0x128   : > { %v1182_v63 = vld [vmem:[#allocation2 + $0x50] sm:$0xff]  ;;  %738 = vst.msk [vmem:[#allocation2 + $0x68] sm:$0xff] %vm724_vm7, %v703_v60  ;;  %730 = vst.msk [vmem:[#allocation2 + $0x28] sm:$0xff] %vm724_vm7, %v687_v61  ;;  %1683 = vmatprep.mubr.msk.f32.mxu0 %vm1200_vm12, %v1174_v62 }
 0x129   : > { %1695 = vmatprep.mubr.msk.f32.mxu1 %vm1200_vm12, %v1182_v63 }
 0x12b   : > { %v806_v0 = vpop.permute.xlu1 %805  ;;  %v790_v1 = vpop.permute.xlu0 %789 }
 0x12c   : > { %842 = vst.msk [vmem:[#allocation2 + $0x60] sm:$0xff] %vm829_vm8, %v806_v0  ;;  %834 = vst.msk [vmem:[#allocation2 + $0x20] sm:$0xff] %vm829_vm8, %v790_v1 }
 0x12f   : > { %v1130_v8 = vpop.permute.xlu1 %1129  ;;  %v1114_v2 = vpop.permute.xlu0 %1113 }
 0x130   : > { %1167 = vst.msk [vmem:[#allocation2 + $0x58] sm:$0xff] %vm1155_vm11, %v1130_v8  ;;  %1159 = vst.msk [vmem:[#allocation2 + $0x18] sm:$0xff] %vm1155_vm11, %v1114_v2 }
 0x133   : > { %v380_v3 = vpop.permute.xlu1 %379  ;;  %v364_v4 = vpop.permute.xlu0 %363 }
 0x134   : > { %413 = vst.msk [vmem:[#allocation2 + $0x78] sm:$0xff] %vm397_vm4, %v380_v3  ;;  %405 = vst.msk [vmem:[#allocation2 + $0x38] sm:$0xff] %vm397_vm4, %v364_v4 }
 0x137   : > { %v484_v5 = vpop.permute.xlu1 %483  ;;  %v468_v7 = vpop.permute.xlu0 %467  ;;  %v1175_v9 = vld [vmem:[#allocation2 + $0x18] sm:$0xff] }
 0x138   : > { %v1183_v11 = vld [vmem:[#allocation2 + $0x58] sm:$0xff]  ;;  %518 = vst.msk [vmem:[#allocation2 + $0x70] sm:$0xff] %vm503_vm5, %v484_v5  ;;  %510 = vst.msk [vmem:[#allocation2 + $0x30] sm:$0xff] %vm503_vm5, %v468_v7  ;;  %1684 = vmatmul.mubr.msk.f32.gmra.mrb[2].mxu0 %vm1200_vm12, %v1175_v9 }
 0x139   : > { %1696 = vmatmul.mubr.msk.f32.gmra.mrb[2].mxu1 %vm1200_vm12, %v1183_v11 }
 0x13b   : > { %v808_v29 = vpop.permute.xlu1 %807  ;;  %v792_v12 = vpop.permute.xlu0 %791 }
 0x13c   : > { %843 = vst.msk [vmem:[#allocation2 + $0x68] sm:$0xff] %vm829_vm8, %v808_v29  ;;  %835 = vst.msk [vmem:[#allocation2 + $0x28] sm:$0xff] %vm829_vm8, %v792_v12 }
 0x13f   : > { %v914_v13 = vpop.permute.xlu1 %913  ;;  %v898_v14 = vpop.permute.xlu0 %897 }
 0x140   : > { %950 = vst.msk [vmem:[#allocation2 + $0x60] sm:$0xff] %vm937_vm9, %v914_v13  ;;  %942 = vst.msk [vmem:[#allocation2 + $0x20] sm:$0xff] %vm937_vm9, %v898_v14 }
 0x143   : > { %v486_v15 = vpop.permute.xlu1 %485  ;;  %v470_v16 = vpop.permute.xlu0 %469 }
 0x144   : > { %519 = vst.msk [vmem:[#allocation2 + $0x78] sm:$0xff] %vm503_vm5, %v486_v15  ;;  %511 = vst.msk [vmem:[#allocation2 + $0x38] sm:$0xff] %vm503_vm5, %v470_v16 }
 0x147   : > { %v592_v17 = vpop.permute.xlu1 %591  ;;  %v576_v19 = vpop.permute.xlu0 %575 }
 0x148   : > { %626 = vst.msk [vmem:[#allocation2 + $0x70] sm:$0xff] %vm611_vm6, %v592_v17  ;;  %618 = vst.msk [vmem:[#allocation2 + $0x30] sm:$0xff] %vm611_vm6, %v576_v19 }
 0x14b   : > { %v916_v21 = vpop.permute.xlu1 %915  ;;  %v900_v23 = vpop.permute.xlu0 %899 }
 0x14c   : > { %951 = vst.msk [vmem:[#allocation2 + $0x68] sm:$0xff] %vm937_vm9, %v916_v21  ;;  %943 = vst.msk [vmem:[#allocation2 + $0x28] sm:$0xff] %vm937_vm9, %v900_v23 }
 0x14f   : > { %v1027_v18 = vpop.permute.xlu1 %1026  ;;  %v1011_v24 = vpop.permute.xlu0 %1010 }
 0x150   : > { %1063 = vst.msk [vmem:[#allocation2 + $0x60] sm:$0xff] %vm1050_vm10, %v1027_v18  ;;  %1055 = vst.msk [vmem:[#allocation2 + $0x20] sm:$0xff] %vm1050_vm10, %v1011_v24 }
 0x153   : > { %v594_v30 = vpop.permute.xlu1 %593  ;;  %v578_v31 = vpop.permute.xlu0 %577 }
 0x154   : > { %627 = vst.msk [vmem:[#allocation2 + $0x78] sm:$0xff] %vm611_vm6, %v594_v30  ;;  %619 = vst.msk [vmem:[#allocation2 + $0x38] sm:$0xff] %vm611_vm6, %v578_v31 }
 0x157   : > { %v705_v32 = vpop.permute.xlu1 %704  ;;  %v689_v20 = vpop.permute.xlu0 %688 }
 0x158   : > { %739 = vst.msk [vmem:[#allocation2 + $0x70] sm:$0xff] %vm724_vm7, %v705_v32  ;;  %731 = vst.msk [vmem:[#allocation2 + $0x30] sm:$0xff] %vm724_vm7, %v689_v20 }
 0x15b   : > { %v1029_v25 = vpop.permute.xlu1 %1028 }
 0x15c   : > { %v1013_v26 = vpop.permute.xlu0 %1012  ;;  %1064 = vst.msk [vmem:[#allocation2 + $0x68] sm:$0xff] %vm1050_vm10, %v1029_v25 }
 0x15d   : > { %1056 = vst.msk [vmem:[#allocation2 + $0x28] sm:$0xff] %vm1050_vm10, %v1013_v26 }
 0x15f   : > { %v1132_v36 = vpop.permute.xlu1 %1131 }
 0x160   : > { %v1116_v27 = vpop.permute.xlu0 %1115  ;;  %1168 = vst.msk [vmem:[#allocation2 + $0x60] sm:$0xff] %vm1155_vm11, %v1132_v36 }
 0x161   : > { %1160 = vst.msk [vmem:[#allocation2 + $0x20] sm:$0xff] %vm1155_vm11, %v1116_v27 }
 0x163   : > { %v707_v37 = vpop.permute.xlu1 %706 }
 0x164   : > { %v691_v38 = vpop.permute.xlu0 %690  ;;  %740 = vst.msk [vmem:[#allocation2 + $0x78] sm:$0xff] %vm724_vm7, %v707_v37 }
 0x165   : > { %732 = vst.msk [vmem:[#allocation2 + $0x38] sm:$0xff] %vm724_vm7, %v691_v38 }
 0x167   : > { %v810_v39 = vpop.permute.xlu1 %809  ;;  %v1184_v40 = vld [vmem:[#allocation2 + $0x60] sm:$0xff] }
 0x168   : > { %v794_v28 = vpop.permute.xlu0 %793  ;;  %v1176_v10 = vld [vmem:[#allocation2 + $0x20] sm:$0xff]  ;;  %844 = vst.msk [vmem:[#allocation2 + $0x70] sm:$0xff] %vm829_vm8, %v810_v39  ;;  %1698 = vmatprep.mubr.msk.f32.mxu1 %vm1200_vm12, %v1184_v40 }
 0x169   : > { %836 = vst.msk [vmem:[#allocation2 + $0x30] sm:$0xff] %vm829_vm8, %v794_v28  ;;  %1686 = vmatprep.mubr.msk.f32.mxu0 %vm1200_vm12, %v1176_v10 }
 0x16b   : > { %v1134_v33 = vpop.permute.xlu1 %1133 }
 0x16c   : > { %v1118_v34 = vpop.permute.xlu0 %1117  ;;  %1169 = vst.msk [vmem:[#allocation2 + $0x68] sm:$0xff] %vm1155_vm11, %v1134_v33 }
 0x16d   : > { %1161 = vst.msk [vmem:[#allocation2 + $0x28] sm:$0xff] %vm1155_vm11, %v1118_v34 }
 0x16f   : > { %v812_v35 = vpop.permute.xlu1 %811 }
 0x170   : > { %v796_v41 = vpop.permute.xlu0 %795  ;;  %845 = vst.msk [vmem:[#allocation2 + $0x78] sm:$0xff] %vm829_vm8, %v812_v35 }
 0x171   : > { %837 = vst.msk [vmem:[#allocation2 + $0x38] sm:$0xff] %vm829_vm8, %v796_v41 }
 0x173   : > { %v918_v42 = vpop.permute.xlu1 %917  ;;  %v1185_v45 = vld [vmem:[#allocation2 + $0x68] sm:$0xff] }
 0x174   : > { %v902_v43 = vpop.permute.xlu0 %901  ;;  %v1177_v44 = vld [vmem:[#allocation2 + $0x28] sm:$0xff]  ;;  %952 = vst.msk [vmem:[#allocation2 + $0x70] sm:$0xff] %vm937_vm9, %v918_v42  ;;  %1699 = vmatmul.mubr.msk.f32.gmra.mrb[4].mxu1 %vm1200_vm12, %v1185_v45 }
 0x175   : > { %944 = vst.msk [vmem:[#allocation2 + $0x30] sm:$0xff] %vm937_vm9, %v902_v43  ;;  %1687 = vmatmul.mubr.msk.f32.gmra.mrb[4].mxu0 %vm1200_vm12, %v1177_v44 }
 0x177   : > { %v920_v46 = vpop.permute.xlu1 %919 }
 0x178   : > { %v904_v6 = vpop.permute.xlu0 %903  ;;  %953 = vst.msk [vmem:[#allocation2 + $0x78] sm:$0xff] %vm937_vm9, %v920_v46 }
 0x179   : > { %945 = vst.msk [vmem:[#allocation2 + $0x38] sm:$0xff] %vm937_vm9, %v904_v6 }
 0x17b   : > { %v1031_v47 = vpop.permute.xlu1 %1030 }
 0x17c   : > { %v1015_v48 = vpop.permute.xlu0 %1014  ;;  %1065 = vst.msk [vmem:[#allocation2 + $0x70] sm:$0xff] %vm1050_vm10, %v1031_v47 }
 0x17d   : > { %1057 = vst.msk [vmem:[#allocation2 + $0x30] sm:$0xff] %vm1050_vm10, %v1015_v48 }
 0x17f   : > { %v1033_v49 = vpop.permute.xlu1 %1032 }
 0x180   : > { %v1017_v50 = vpop.permute.xlu0 %1016  ;;  %1066 = vst.msk [vmem:[#allocation2 + $0x78] sm:$0xff] %vm1050_vm10, %v1033_v49 }
 0x181   : > { %1058 = vst.msk [vmem:[#allocation2 + $0x38] sm:$0xff] %vm1050_vm10, %v1017_v50 }
 0x183   : > { %v1136_v51 = vpop.permute.xlu1 %1135 }
 0x184   : > { %v1120_v52 = vpop.permute.xlu0 %1119  ;;  %1170 = vst.msk [vmem:[#allocation2 + $0x70] sm:$0xff] %vm1155_vm11, %v1136_v51 }
 0x185   : > { %1162 = vst.msk [vmem:[#allocation2 + $0x30] sm:$0xff] %vm1155_vm11, %v1120_v52 }
 0x187   : > { %v1138_v53 = vpop.permute.xlu1 %1137 }
 0x188   : > { %v1122_v22 = vpop.permute.xlu0 %1121  ;;  %1171 = vst.msk [vmem:[#allocation2 + $0x78] sm:$0xff] %vm1155_vm11, %v1138_v53 }
 0x189   : > { %1163 = vst.msk [vmem:[#allocation2 + $0x38] sm:$0xff] %vm1155_vm11, %v1122_v22 }
 0x18b   : > { %v1186_v55 = vld [vmem:[#allocation2 + $0x70] sm:$0xff] }
 0x18c   : > { %v1178_v54 = vld [vmem:[#allocation2 + $0x30] sm:$0xff]  ;;  %1701 = vmatprep.mubr.msk.f32.mxu1 %vm1200_vm12, %v1186_v55 }
 0x18d   : > { %1689 = vmatprep.mubr.msk.f32.mxu0 %vm1200_vm12, %v1178_v54 }
 0x18f   : > { %v1187_v57 = vld [vmem:[#allocation2 + $0x78] sm:$0xff] }
 0x190   : > { %v1179_v56 = vld [vmem:[#allocation2 + $0x38] sm:$0xff]  ;;  %1702 = vmatmul.mubr.msk.f32.gmra.mrb[6].mxu1 %vm1200_vm12, %v1187_v57 }
 0x191   : > { %1690 = vmatmul.mubr.msk.f32.gmra.mrb[6].mxu0 %vm1200_vm12, %v1179_v56 }
 0x1cb   : > { %v1682_v59 = vpop.f32.mrb[0].mxu0 }
 0x1cc   : > { %v1694_v60 = vpop.f32.mrb[0].mxu1  ;;  %v1325_v61 = vadd.f32 %v1682_v59, %v1629_v58  ;;  %v1319_v63 = vpop.f32.mrb[1].mxu0 }
 0x1cd   : > { %v1365_v62 = vadd.f32 %v1694_v60, %v1629_v58  ;;  %v1359_v0 = vpop.f32.mrb[1].mxu1  ;;  %v1320_v1 = vadd.f32 %v1629_v58, %v1319_v63 }
 0x1ce   : > { %v1360_v8 = vadd.f32 %v1629_v58, %v1359_v0  ;;  %v1399_v2 = vmax.f32 %v1325_v61, 0.0 }
 0x1cf   : > { %v1407_v3 = vmax.f32 %v1365_v62, 0.0  ;;  %v1398_v4 = vmax.f32 %v1320_v1, 0.0 }
 0x1d0   : > { %v1406_v5 = vmax.f32 %v1360_v8, 0.0  ;;  %1415 = vst [vmem:[%s2490_s4 + $0x8] sm:$0xff] %v1399_v2 }
 0x1d1   : > { %1423 = vst [vmem:[%s2490_s4 + $0x48] sm:$0xff] %v1407_v3  ;;  %1414 = vst [vmem:[%s2490_s4] sm:$0xff] %v1398_v4 }
 0x1d2   : > { %1422 = vst [vmem:[%s2490_s4 + $0x40] sm:$0xff] %v1406_v5 }
 0x20b   : > { %v1685_v7 = vpop.f32.mrb[2].mxu0 }
 0x20c   : > { %v1697_v9 = vpop.f32.mrb[2].mxu1  ;;  %v1335_v11 = vadd.f32 %v1685_v7, %v1629_v58  ;;  %v1329_v12 = vpop.f32.mrb[3].mxu0 }
 0x20d   : > { %v1375_v29 = vadd.f32 %v1697_v9, %v1629_v58  ;;  %v1369_v13 = vpop.f32.mrb[3].mxu1  ;;  %v1330_v14 = vadd.f32 %v1629_v58, %v1329_v12 }
 0x20e   : > { %v1370_v15 = vadd.f32 %v1629_v58, %v1369_v13  ;;  %v1401_v16 = vmax.f32 %v1335_v11, 0.0 }
 0x20f   : > { %v1409_v17 = vmax.f32 %v1375_v29, 0.0  ;;  %v1400_v19 = vmax.f32 %v1330_v14, 0.0 }
 0x210   : > { %v1408_v21 = vmax.f32 %v1370_v15, 0.0  ;;  %1417 = vst [vmem:[%s2490_s4 + $0x18] sm:$0xff] %v1401_v16 }
 0x211   : > { %1425 = vst [vmem:[%s2490_s4 + $0x58] sm:$0xff] %v1409_v17  ;;  %1416 = vst [vmem:[%s2490_s4 + $0x10] sm:$0xff] %v1400_v19 }
 0x212   : > { %1424 = vst [vmem:[%s2490_s4 + $0x50] sm:$0xff] %v1408_v21 }
 0x247   : > { %v1700_v18 = vpop.f32.mrb[4].mxu1 }
 0x248   : > { %v1688_v23 = vpop.f32.mrb[4].mxu0  ;;  %v1385_v30 = vadd.f32 %v1700_v18, %v1629_v58  ;;  %v1379_v32 = vpop.f32.mrb[5].mxu1 }
 0x249   : > { %v1345_v24 = vadd.f32 %v1688_v23, %v1629_v58  ;;  %v1339_v31 = vpop.f32.mrb[5].mxu0  ;;  %v1380_v25 = vadd.f32 %v1629_v58, %v1379_v32 }
 0x24a   : > { %v1340_v20 = vadd.f32 %v1629_v58, %v1339_v31  ;;  %v1411_v36 = vmax.f32 %v1385_v30, 0.0 }
 0x24b   : > { %v1403_v26 = vmax.f32 %v1345_v24, 0.0  ;;  %v1410_v37 = vmax.f32 %v1380_v25, 0.0 }
 0x24c   : > { %v1402_v27 = vmax.f32 %v1340_v20, 0.0  ;;  %1427 = vst [vmem:[%s2490_s4 + $0x68] sm:$0xff] %v1411_v36 }
 0x24d   : > { %1419 = vst [vmem:[%s2490_s4 + $0x28] sm:$0xff] %v1403_v26  ;;  %1426 = vst [vmem:[%s2490_s4 + $0x60] sm:$0xff] %v1410_v37 }
 0x24e   : > { %1418 = vst [vmem:[%s2490_s4 + $0x20] sm:$0xff] %v1402_v27 }
 0x263   : > { %v1703_v39 = vpop.f32.mrb[6].mxu1 }
 0x264   : > { %v1691_v38 = vpop.f32.mrb[6].mxu0  ;;  %v1395_v10 = vadd.f32 %v1703_v39, %v1629_v58  ;;  %v1389_v33 = vpop.f32.mrb[7].mxu1 }
 0x265   : > { %v1355_v28 = vadd.f32 %v1691_v38, %v1629_v58  ;;  %v1349_v40 = vpop.f32.mrb[7].mxu0  ;;  %v1390_v35 = vadd.f32 %v1629_v58, %v1389_v33 }
 0x266   : > { %v1350_v34 = vadd.f32 %v1629_v58, %v1349_v40  ;;  %v1413_v42 = vmax.f32 %v1395_v10, 0.0 }
 0x267   : > { %v1405_v41 = vmax.f32 %v1355_v28, 0.0  ;;  %v1412_v44 = vmax.f32 %v1390_v35, 0.0 }
 0x268   : > { %v1404_v43 = vmax.f32 %v1350_v34, 0.0  ;;  %1429 = vst [vmem:[%s2490_s4 + $0x78] sm:$0xff] %v1413_v42 }
 0x269   : > { %1421 = vst [vmem:[%s2490_s4 + $0x38] sm:$0xff] %v1405_v41  ;;  %1428 = vst [vmem:[%s2490_s4 + $0x70] sm:$0xff] %v1412_v44 }
 0x26a   : > { %1420 = vst [vmem:[%s2490_s4 + $0x30] sm:$0xff] %v1404_v43 }
 0x26b PF: > { %s13_s16 = sadd.s32 1, %s1805_s16   ;;  %s2527_s12 = smov %s1797_s14 }
 0x26c   : > { %p10_p7 = scmp.ge.s32.totalorder %s13_s16, 6   ;;  %s2528_s13 = smov %s1801_s15 }
 0x26d   : > { %s2529_s14 = smov %s2532_s17  ;;  %s2530_s15 = smov %s2536_s18 }
 0x26e   :  { %12 = sbr.rel (!%p10_p7) target bundleno = 3 (0x3), region = 71 }

</bundles_post_ra>
